<compile_context>
chip_gen: v7x
topology: tpu7x:2x2x1
jax: 0.10.0
libtpu: 0.0.40
codegen_flags: <defaults>
</compile_context>

<pallas_src>
import functools
import math

import jax
import jax.numpy as jnp
from jax.experimental import pallas as pl
from jax.experimental.pallas import tpu as pltpu

_LN_EPS = 1e-5            # torch.nn.LayerNorm default eps
_NORMALIZE_EPS = 1e-12    # torch.nn.functional.normalize default eps
_NEG_BIG = -1e30          # finite "-inf" for masking padded keys/columns


def _round_up(a, b):
    return (a + b - 1) // b * b


# ------------------------- sizing helpers (trace time, Python) -------------------------

@functools.lru_cache(maxsize=None)
def _vmem_limit_and_budget():
    """Per-generation VMEM sizing: v7x has 64 MiB/TC, v5e/v6e have 128 MiB."""
    cap = 64 * 1024 * 1024                       # conservative fallback (v7x)
    try:
        cap = int(pltpu.get_tpu_info().vmem_capacity_bytes)
    except Exception:
        pass
    limit = max(32 * 1024 * 1024, min(int(cap * 3 // 4), 112 * 1024 * 1024))
    # Block-sizing budget: leave headroom for compiler temps / uncounted buffers.
    return limit, limit // 2


def _fit_rows(per_row_bytes, fixed_bytes, quad_bytes, budget, lo, hi):
    """Largest row tile t (multiple of 8) with quad*t^2 + per_row*t + fixed <= budget."""
    avail = budget - fixed_bytes
    if avail <= per_row_bytes * lo + quad_bytes * lo * lo:
        return lo
    if quad_bytes > 0:
        t = (math.sqrt(per_row_bytes * per_row_bytes + 4.0 * quad_bytes * avail)
             - per_row_bytes) / (2.0 * quad_bytes)
    else:
        t = avail / max(per_row_bytes, 1)
    t = (int(t) // 8) * 8
    return max(lo, min(hi, t))


def _choose_tile(n, t_max, *, step_cost, quadratic):
    """Pick a row tile minimizing padded work + per-grid-step overhead.

    quadratic=True  -> cost ~ Np^2 + step_cost * num_steps^2   (cn: 2-D grid)
    quadratic=False -> cost ~ Np   + step_cost * num_steps     (ln/dcn: 1-D grid)
    """
    t_max = max(8, (t_max // 8) * 8)
    n8 = _round_up(n, 8)
    cands = {t_max}
    if n8 <= t_max:
        cands.add(n8)                                  # single tile, minimal padding
    for t in range(256, t_max + 1, 128):               # lane/MXU-friendly sizes
        cands.add(t)
    for k in range(2, 9):                              # near-zero-padding splits
        t = _round_up(-(-n // k), 8)
        if 8 <= t <= t_max:
            cands.add(t)
    best = None
    for t in sorted(cands, reverse=True):
        np_ = _round_up(n, t)
        steps = np_ // t
        if quadratic:
            cost = float(np_) * np_ + step_cost * float(steps) * steps
        else:
            cost = float(np_) + step_cost * float(steps)
        if best is None or cost < best[0]:
            best = (cost, t, np_)
    return best[1], best[2]


# ------------------------- in-kernel helpers -------------------------

def _layer_norm(y, gamma, beta, h_real):
    """LayerNorm over last dim.  Assumes padded columns (>= h_real) of y are exactly 0."""
    hp = y.shape[-1]
    inv_h = 1.0 / float(h_real)
    mu = jnp.sum(y, axis=-1, keepdims=True) * inv_h
    d = y - mu
    if hp != h_real:  # zero padded columns so they don't pollute the variance
        col = jax.lax.broadcasted_iota(jnp.int32, (1, hp), 1)
        d = d * (col < h_real).astype(y.dtype)
    var = jnp.sum(d * d, axis=-1, keepdims=True) * inv_h
    return d * jax.lax.rsqrt(var + _LN_EPS) * gamma + beta


def _row_normalize(x):
    # 1 / max(||x||, eps) == rsqrt(max(||x||^2, eps^2)); rsqrt runs on the EUP.
    sq = jnp.sum(x * x, axis=-1, keepdims=True)
    inv = jax.lax.rsqrt(jnp.maximum(sq, _NORMALIZE_EPS * _NORMALIZE_EPS))
    return x * inv


def _as_mxu(x_raw, x_f32, mxu_dtype):
    """MXU operand without a redundant cast pass when dtypes already match."""
    return x_raw if x_raw.dtype == mxu_dtype else x_f32.astype(mxu_dtype)


# ------------------------- kernels -------------------------

def _ln_kernel(x_ref, gamma_ref, beta_ref, o_ref, *, h_real):
    x = x_ref[...].astype(jnp.float32)
    o_ref[...] = _layer_norm(x, gamma_ref[...], beta_ref[...], h_real).astype(o_ref.dtype)


def _cn_kernel(xq_ref, xk_ref, gamma_ref, beta_ref, o_ref,
               m_sc, l_sc, acc_sc, nq_sc, *,
               scale, inv_tau, n_real, h_real, tk, mask_keys, mxu_dtype):
    ki = pl.program_id(1)

    @pl.when(ki == 0)
    def _init():
        m_sc[...] = jnp.full(m_sc.shape, _NEG_BIG, m_sc.dtype)
        l_sc[...] = jnp.zeros(l_sc.shape, l_sc.dtype)
        acc_sc[...] = jnp.zeros(acc_sc.shape, acc_sc.dtype)
        # Query normalization (tau folded in) hoisted out of the key loop:
        # computed once per q tile, reused for every key tile.
        xq = xq_ref[...].astype(jnp.float32)
        nq_sc[...] = (_row_normalize(xq) * inv_tau).astype(nq_sc.dtype)

    xk_raw = xk_ref[...]
    xk_f32 = xk_raw.astype(jnp.float32)
    nk = _row_normalize(xk_f32).astype(mxu_dtype)

    # s[q, k] = <nq[q], nk[k]> / tau  (TQ x TK), fp32 accumulation on the MXU.
    s = jax.lax.dot_general(
        nq_sc[...], nk, (((1,), (1,)), ((), ())),
        preferred_element_type=jnp.float32)

    if mask_keys:  # mask padded key rows (only compiled in when N was padded)
        key_idx = ki * tk + jax.lax.broadcasted_iota(jnp.int32, (1, s.shape[-1]), 1)
        s = jnp.where(key_idx < n_real, s, _NEG_BIG)

    # Online softmax update.
    m_prev = m_sc[...]
    m_new = jnp.maximum(m_prev, jnp.max(s, axis=-1, keepdims=True))
    alpha = jnp.exp(m_prev - m_new)
    p = jnp.exp(s - m_new)
    l_sc[...] = alpha * l_sc[...] + jnp.sum(p, axis=-1, keepdims=True)
    acc_sc[...] = alpha * acc_sc[...] + jax.lax.dot_general(
        p.astype(mxu_dtype), _as_mxu(xk_raw, xk_f32, mxu_dtype),
        (((1,), (0,)), ((), ())),
        preferred_element_type=jnp.float32)
    m_sc[...] = m_new

    @pl.when(ki == pl.num_programs(1) - 1)
    def _finalize():
        xq = xq_ref[...].astype(jnp.float32)       # block is resident across the k loop
        x_neg = acc_sc[...] * pl.reciprocal(l_sc[...], approx=False)
        y = xq + scale * (xq - x_neg)              # == (1+scale)*x - scale*x_neg
        o_ref[...] = _layer_norm(y, gamma_ref[...], beta_ref[...], h_real
                                 ).astype(o_ref.dtype)


def _dcn_sim_kernel(x_ref, sim_ref, acc_ref, *, inv_tau, h_real, mxu_dtype):
    """Pass 1: sim = softmax( (norm_x.T @ norm_x) / tau ); f32 accumulation over row
    tiles in VMEM scratch, written once (possibly as bf16) on the last step."""
    i = pl.program_id(0)

    @pl.when(i == 0)
    def _init():
        acc_ref[...] = jnp.zeros(acc_ref.shape, acc_ref.dtype)

    x = x_ref[...].astype(jnp.float32)
    nx = _row_normalize(x).astype(mxu_dtype)         # padded rows are exactly zero
    acc_ref[...] += jax.lax.dot_general(
        nx, nx, (((0,), (0,)), ((), ())),
        preferred_element_type=jnp.float32)          # (Hp, Hp)

    @pl.when(i == pl.num_programs(0) - 1)
    def _finalize():
        s = acc_ref[...] * inv_tau                   # fold tau once, on H x H only
        hp = s.shape[-1]
        if hp != h_real:                             # mask padded hidden columns
            col = jax.lax.broadcasted_iota(jnp.int32, (1, hp), 1)
            s = jnp.where(col < h_real, s, _NEG_BIG)
        m = jnp.max(s, axis=-1, keepdims=True)
        e = jnp.exp(s - m)
        sm = e * pl.reciprocal(jnp.sum(e, axis=-1, keepdims=True), approx=False)
        sim_ref[...] = sm.astype(sim_ref.dtype)


def _dcn_apply_kernel(x_ref, sim_ref, gamma_ref, beta_ref, o_ref, *, scale, h_real):
    """Pass 2 (row-tiled): x_neg = x @ sim, contrastive mix, LayerNorm."""
    x_raw = x_ref[...]
    x_f32 = x_raw.astype(jnp.float32)
    sim = sim_ref[...]                               # already in the MXU dtype
    x_neg = jax.lax.dot_general(
        _as_mxu(x_raw, x_f32, sim.dtype), sim,
        (((1,), (0,)), ((), ())),
        preferred_element_type=jnp.float32)
    y = x_f32 + scale * (x_f32 - x_neg)
    o_ref[...] = _layer_norm(y, gamma_ref[...], beta_ref[...], h_real
                             ).astype(o_ref.dtype)


# ------------------------- wrapper -------------------------

def _pad2(a, rows, cols):
    if a.shape == (rows, cols):
        return a
    return jnp.zeros((rows, cols), a.dtype).at[:a.shape[0], :a.shape[1]].set(a)


def _cparams(sem, vmem_limit):
    return pltpu.CompilerParams(dimension_semantics=sem,
                                vmem_limit_bytes=int(vmem_limit))


def norm_layer_forward(x, gamma, beta, *, norm_type, scale, tau=1.0,
                       force_bf16_matmul=False):
    if norm_type not in ("cn", "dcn", "ln"):
        # TODO(synk): 'zca' branch (torch.linalg.svd) has no Pallas TPU equivalent.
        raise NotImplementedError(norm_type)

    N, H = x.shape
    out_dtype = x.dtype
    mxu_dtype = (jnp.bfloat16 if (x.dtype == jnp.bfloat16 or force_bf16_matmul)
                 else jnp.float32)

    ib = int(x.dtype.itemsize)
    mb = int(jnp.dtype(mxu_dtype).itemsize)
    limit, budget = _vmem_limit_and_budget()

    # Lane-dense hidden dim (multiple of 128); padded columns are zero.
    Hp = _round_up(H, 128)
    gamma_p = _pad2(gamma.reshape(1, H).astype(jnp.float32), 1, Hp)
    beta_p = _pad2(beta.reshape(1, H).astype(jnp.float32), 1, Hp)

    scale = float(scale)
    inv_tau = 1.0 / float(tau)

    def maybe_slice(out, Np):
        return out if (Np == N and Hp == H) else out[:N, :H]

    if norm_type == "ln":
        # Memory-bound: size the row tile by bytes (in + out double-buffered + temps).
        per_row = Hp * (2 * ib + 2 * ib + 8)
        t_max = _fit_rows(per_row, 0, 0, budget, 128, 8192)
        tile, Np = _choose_tile(N, t_max, step_cost=1500.0, quadratic=False)
        xp = _pad2(x, Np, Hp)
        out = pl.pallas_call(
            functools.partial(_ln_kernel, h_real=H),
            out_shape=jax.ShapeDtypeStruct((Np, Hp), out_dtype),
            grid_spec=pltpu.PrefetchScalarGridSpec(
                num_scalar_prefetch=0,
                grid=(Np // tile,),
                in_specs=[pl.BlockSpec((tile, Hp), lambda i: (i, 0)),
                          pl.BlockSpec((1, Hp), lambda i: (0, 0)),
                          pl.BlockSpec((1, Hp), lambda i: (0, 0))],
                out_specs=pl.BlockSpec((tile, Hp), lambda i: (i, 0))),
            compiler_params=_cparams(("parallel",), limit),
        )(xp, gamma_p, beta_p)
        return maybe_slice(out, Np)

    if norm_type == "cn":
        # VMEM per block ~ linear in t (q/k/out buffers + acc + nq) + quadratic (s, p).
        per_row = Hp * (4 * ib + 2 * ib + 4 + mb + 12)
        t_max = _fit_rows(per_row, 0, 12.0, budget, 128, 1024)
        t, Np = _choose_tile(N, t_max, step_cost=4.0e5, quadratic=True)
        xp = _pad2(x, Np, Hp)
        kernel = functools.partial(
            _cn_kernel, scale=scale, inv_tau=inv_tau, n_real=N, h_real=H,
            tk=t, mask_keys=(Np != N), mxu_dtype=mxu_dtype)
        out = pl.pallas_call(
            kernel,
            out_shape=jax.ShapeDtypeStruct((Np, Hp), out_dtype),
            grid_spec=pltpu.PrefetchScalarGridSpec(
                num_scalar_prefetch=0,
                grid=(Np // t, Np // t),
                in_specs=[pl.BlockSpec((t, Hp), lambda qi, ki: (qi, 0)),   # x (queries)
                          pl.BlockSpec((t, Hp), lambda qi, ki: (ki, 0)),   # x (keys/values)
                          pl.BlockSpec((1, Hp), lambda qi, ki: (0, 0)),
                          pl.BlockSpec((1, Hp), lambda qi, ki: (0, 0))],
                out_specs=pl.BlockSpec((t, Hp), lambda qi, ki: (qi, 0)),
                scratch_shapes=[pltpu.VMEM((t, 1), jnp.float32),    # running max
                                pltpu.VMEM((t, 1), jnp.float32),    # running sum
                                pltpu.VMEM((t, Hp), jnp.float32),   # acc
                                pltpu.VMEM((t, Hp), mxu_dtype)]),   # hoisted nq
            compiler_params=_cparams(("parallel", "arbitrary"), limit),
        )(xp, xp, gamma_p, beta_p)
        return maybe_slice(out, Np)

    # norm_type == "dcn"
    sim_dtype = mxu_dtype
    sb = int(jnp.dtype(sim_dtype).itemsize)
    fixed1 = Hp * Hp * (4 + 2 * sb)                      # f32 scratch + sim output
    per_row1 = Hp * (2 * ib + 4 + mb + 8)
    fixed2 = 2 * Hp * Hp * sb                            # resident sim input
    per_row2 = Hp * (2 * ib + 2 * ib + 4 + mb + 8)
    t_max = min(_fit_rows(per_row1, fixed1, 0, budget, 128, 4096),
                _fit_rows(per_row2, fixed2, 0, budget, 128, 4096))
    t, Np = _choose_tile(N, t_max, step_cost=1500.0, quadratic=False)
    xp = _pad2(x, Np, Hp)

    sim = pl.pallas_call(
        functools.partial(_dcn_sim_kernel, inv_tau=inv_tau, h_real=H,
                          mxu_dtype=mxu_dtype),
        out_shape=jax.ShapeDtypeStruct((Hp, Hp), sim_dtype),
        grid_spec=pltpu.PrefetchScalarGridSpec(
            num_scalar_prefetch=0,
            grid=(Np // t,),
            in_specs=[pl.BlockSpec((t, Hp), lambda i: (i, 0))],
            out_specs=pl.BlockSpec((Hp, Hp), lambda i: (0, 0)),
            scratch_shapes=[pltpu.VMEM((Hp, Hp), jnp.float32)]),
        compiler_params=_cparams(("arbitrary",), limit),
    )(xp)

    out = pl.pallas_call(
        functools.partial(_dcn_apply_kernel, scale=scale, h_real=H),
        out_shape=jax.ShapeDtypeStruct((Np, Hp), out_dtype),
        grid_spec=pltpu.PrefetchScalarGridSpec(
            num_scalar_prefetch=0,
            grid=(Np // t,),
            in_specs=[pl.BlockSpec((t, Hp), lambda i: (i, 0)),
                      pl.BlockSpec((Hp, Hp), lambda i: (0, 0)),
                      pl.BlockSpec((1, Hp), lambda i: (0, 0)),
                      pl.BlockSpec((1, Hp), lambda i: (0, 0))],
            out_specs=pl.BlockSpec((t, Hp), lambda i: (i, 0))),
        compiler_params=_cparams(("parallel",), limit),
    )(xp, sim, gamma_p, beta_p)
    return maybe_slice(out, Np)


# ------------------------- pure-JAX reference -------------------------

def _reference(x, gamma, beta, norm_type, scale, tau):
    hi = jax.lax.Precision.HIGHEST

    def ln(y):
        mu = jnp.mean(y, axis=-1, keepdims=True)
        var = jnp.mean((y - mu) ** 2, axis=-1, keepdims=True)
        return (y - mu) / jnp.sqrt(var + _LN_EPS) * gamma + beta

    if norm_type == "ln":
        return ln(x)
    norm = jnp.linalg.norm(x, axis=1, keepdims=True)
    nx = x / jnp.maximum(norm, _NORMALIZE_EPS)
    if norm_type == "cn":
        sim = jax.nn.softmax(jnp.matmul(nx, nx.T, precision=hi) / tau, axis=1)
        x_neg = jnp.matmul(sim, x, precision=hi)
    else:  # dcn
        sim = jax.nn.softmax(jnp.matmul(nx.T, nx, precision=hi) / tau, axis=1)
        x_neg = jnp.matmul(x, sim, precision=hi)
    return ln((1.0 + scale) * x - scale * x_neg)


# ------------------------- main -------------------------

if __name__ == "__main__":
    scale, tau = 0.5, 1.0

    # (N, H, tol): small demo shape; a shape exercising column padding with a
    # single (unpadded) row tile; a shape exercising the multi-key-tile online
    # softmax / hoisted-nq path and the dcn reduction grid.
    cases = [(8, 32, 1e-4), (600, 200, 5e-4), (1500, 96, 1e-3)]

    for idx, (N, H, tol) in enumerate(cases):
        kx, kg, kb = jax.random.split(jax.random.fold_in(jax.random.PRNGKey(0), idx), 3)
        x = jax.random.normal(kx, (N, H), jnp.float32)
        gamma = 1.0 + 0.1 * jax.random.normal(kg, (H,), jnp.float32)
        beta = 0.1 * jax.random.normal(kb, (H,), jnp.float32)

        for nt in ("cn", "dcn", "ln"):
            out = jax.block_until_ready(
                norm_layer_forward(x, gamma, beta, norm_type=nt, scale=scale, tau=tau))
            ref = _reference(x, gamma, beta, nt, scale, tau)
            assert out.shape == (N, H) and out.dtype == x.dtype, (nt, N, H)
            err = float(jnp.max(jnp.abs(out - ref)))
            assert jnp.allclose(out, ref, atol=tol, rtol=tol), (nt, N, H, err)

    print("KERNEL_OK")
</pallas_src>

<mosaic_0001>
module attributes {stable_mosaic.version = 11 : i64} {
  func.func @_cn_kernel(%arg0: i32, %arg1: i32, %arg2: memref<8x128xf32, #tpu.memory_space<vmem>>, %arg3: memref<8x128xf32, #tpu.memory_space<vmem>>, %arg4: memref<1x128xf32, #tpu.memory_space<vmem>>, %arg5: memref<1x128xf32, #tpu.memory_space<vmem>>, %arg6: memref<8x128xf32, #tpu.memory_space<vmem>>, %arg7: memref<8x1xf32, #tpu.memory_space<vmem>>, %arg8: memref<8x1xf32, #tpu.memory_space<vmem>>, %arg9: memref<8x128xf32, #tpu.memory_space<vmem>>, %arg10: memref<8x128xf32, #tpu.memory_space<vmem>>) attributes {dimension_semantics = [#tpu.dimension_semantics<parallel>, #tpu.dimension_semantics<arbitrary>], iteration_bounds = array<i64: 1, 1>, scalar_prefetch = 0 : i64, scratch_operands = 4 : i64, tpu.core_type = #tpu.core_type<tc>, window_params = [{transform_indices = @transform_0, window_bounds = array<i64: 8, 128>}, {transform_indices = @transform_1, window_bounds = array<i64: 8, 128>}, {pipeline_mode = #tpu.pipeline_mode<synchronous>, transform_indices = @transform_2, window_bounds = array<i64: 1, 128>}, {pipeline_mode = #tpu.pipeline_mode<synchronous>, transform_indices = @transform_3, window_bounds = array<i64: 1, 128>}, {transform_indices = @transform_4, window_bounds = array<i64: 8, 128>}]} {
    %c0_i32 = arith.constant 0 : i32
    %0 = arith.cmpi eq, %arg1, %c0_i32 : i32
    %1 = arith.extui %0 : i1 to i32
    %c0_i32_0 = arith.constant 0 : i32
    %2 = arith.cmpi ne, %1, %c0_i32_0 : i32
    scf.if %2 {
      %cst_23 = arith.constant -1.000000e+30 : f32
      %39 = vector.broadcast %cst_23 : f32 to vector<8x1xf32>
      %c0_24 = arith.constant 0 : index
      %c0_25 = arith.constant 0 : index
      %40 = vector.load %arg7[%c0_24, %c0_25] : memref<8x1xf32, #tpu.memory_space<vmem>>, vector<8x1xf32>
      tpu.vector_store %arg7[%c0_24, %c0_25], %39 {strides = array<i32>} : memref<8x1xf32, #tpu.memory_space<vmem>>, vector<8x1xf32>,
      %cst_26 = arith.constant 0.000000e+00 : f32
      %41 = vector.broadcast %cst_26 : f32 to vector<8x1xf32>
      %c0_27 = arith.constant 0 : index
      %c0_28 = arith.constant 0 : index
      %42 = vector.load %arg8[%c0_27, %c0_28] : memref<8x1xf32, #tpu.memory_space<vmem>>, vector<8x1xf32>
      tpu.vector_store %arg8[%c0_27, %c0_28], %41 {strides = array<i32>} : memref<8x1xf32, #tpu.memory_space<vmem>>, vector<8x1xf32>,
      %cst_29 = arith.constant 0.000000e+00 : f32
      %43 = vector.broadcast %cst_29 : f32 to vector<8x128xf32>
      %c0_30 = arith.constant 0 : index
      %c0_31 = arith.constant 0 : index
      %44 = vector.load %arg9[%c0_30, %c0_31] : memref<8x128xf32, #tpu.memory_space<vmem>>, vector<8x128xf32>
      tpu.vector_store %arg9[%c0_30, %c0_31], %43 {strides = array<i32>} : memref<8x128xf32, #tpu.memory_space<vmem>>, vector<8x128xf32>,
      %c0_32 = arith.constant 0 : index
      %c0_33 = arith.constant 0 : index
      %45 = vector.load %arg2[%c0_32, %c0_33] : memref<8x128xf32, #tpu.memory_space<vmem>>, vector<8x128xf32>
      %46 = arith.mulf %45, %45 : vector<8x128xf32>
      %cst_34 = arith.constant dense<0.000000e+00> : vector<8xf32>
      %47 = vector.multi_reduction <add>, %46, %cst_34 [1] : vector<8x128xf32> to vector<8xf32>
      %48 = vector.shape_cast %47 : vector<8xf32> to vector<8x1xf32>
      %cst_35 = arith.constant 1.000000e-24 : f32
      %49 = vector.broadcast %cst_35 : f32 to vector<8x1xf32>
      %50 = arith.maximumf %48, %49 : vector<8x1xf32>
      %51 = math.rsqrt %50 : vector<8x1xf32>
      %52 = vector.broadcast %51 : vector<8x1xf32> to vector<8x128xf32>
      %53 = arith.mulf %45, %52 : vector<8x128xf32>
      %cst_36 = arith.constant 1.000000e+00 : f32
      %54 = vector.broadcast %cst_36 : f32 to vector<8x128xf32>
      %55 = arith.mulf %53, %54 : vector<8x128xf32>
      %c0_37 = arith.constant 0 : index
      %c0_38 = arith.constant 0 : index
      %56 = vector.load %arg10[%c0_37, %c0_38] : memref<8x128xf32, #tpu.memory_space<vmem>>, vector<8x128xf32>
      tpu.vector_store %arg10[%c0_37, %c0_38], %55 {strides = array<i32>} : memref<8x128xf32, #tpu.memory_space<vmem>>, vector<8x128xf32>,
    } else {
    }
    %c0 = arith.constant 0 : index
    %c0_1 = arith.constant 0 : index
    %3 = vector.load %arg3[%c0, %c0_1] : memref<8x128xf32, #tpu.memory_space<vmem>>, vector<8x128xf32>
    %4 = arith.mulf %3, %3 : vector<8x128xf32>
    %cst = arith.constant dense<0.000000e+00> : vector<8xf32>
    %5 = vector.multi_reduction <add>, %4, %cst [1] : vector<8x128xf32> to vector<8xf32>
    %6 = vector.shape_cast %5 : vector<8xf32> to vector<8x1xf32>
    %cst_2 = arith.constant 1.000000e-24 : f32
    %7 = vector.broadcast %cst_2 : f32 to vector<8x1xf32>
    %8 = arith.maximumf %6, %7 : vector<8x1xf32>
    %9 = math.rsqrt %8 : vector<8x1xf32>
    %10 = vector.broadcast %9 : vector<8x1xf32> to vector<8x128xf32>
    %11 = arith.mulf %3, %10 : vector<8x128xf32>
    %c0_3 = arith.constant 0 : index
    %c0_4 = arith.constant 0 : index
    %12 = vector.load %arg10[%c0_3, %c0_4] : memref<8x128xf32, #tpu.memory_space<vmem>>, vector<8x128xf32>
    %cst_5 = arith.constant dense<0.000000e+00> : vector<8x8xf32>
    %13 = tpu.matmul %12, %11, %cst_5 {dimension_numbers = #tpu.dot_dimension_numbers<[1], [1], [0], [0], [0, 0, 1, 0], [], []>} : vector<8x128xf32>, vector<8x128xf32>, vector<8x8xf32> -> vector<8x8xf32>
    %c0_6 = arith.constant 0 : index
    %c0_7 = arith.constant 0 : index
    %14 = vector.load %arg7[%c0_6, %c0_7] : memref<8x1xf32, #tpu.memory_space<vmem>>, vector<8x1xf32>
    %cst_8 = arith.constant dense<0xFF800000> : vector<8xf32>
    %15 = vector.multi_reduction <maximumf>, %13, %cst_8 [1] : vector<8x8xf32> to vector<8xf32>
    %16 = vector.shape_cast %15 : vector<8xf32> to vector<8x1xf32>
    %17 = arith.maximumf %14, %16 : vector<8x1xf32>
    %18 = arith.subf %14, %17 : vector<8x1xf32>
    %19 = math.exp %18 : vector<8x1xf32>
    %20 = vector.broadcast %17 : vector<8x1xf32> to vector<8x8xf32>
    %21 = arith.subf %13, %20 : vector<8x8xf32>
    %22 = math.exp %21 : vector<8x8xf32>
    %c0_9 = arith.constant 0 : index
    %c0_10 = arith.constant 0 : index
    %23 = vector.load %arg8[%c0_9, %c0_10] : memref<8x1xf32, #tpu.memory_space<vmem>>, vector<8x1xf32>
    %24 = arith.mulf %19, %23 : vector<8x1xf32>
    %cst_11 = arith.constant dense<0.000000e+00> : vector<8xf32>
    %25 = vector.multi_reduction <add>, %22, %cst_11 [1] : vector<8x8xf32> to vector<8xf32>
    %26 = vector.shape_cast %25 : vector<8xf32> to vector<8x1xf32>
    %27 = arith.addf %24, %26 : vector<8x1xf32>
    %c0_12 = arith.constant 0 : index
    %c0_13 = arith.constant 0 : index
    %28 = vector.load %arg8[%c0_12, %c0_13] : memref<8x1xf32, #tpu.memory_space<vmem>>, vector<8x1xf32>
    tpu.vector_store %arg8[%c0_12, %c0_13], %27 {strides = array<i32>} : memref<8x1xf32, #tpu.memory_space<vmem>>, vector<8x1xf32>,
    %c0_14 = arith.constant 0 : index
    %c0_15 = arith.constant 0 : index
    %29 = vector.load %arg9[%c0_14, %c0_15] : memref<8x128xf32, #tpu.memory_space<vmem>>, vector<8x128xf32>
    %30 = vector.broadcast %19 : vector<8x1xf32> to vector<8x128xf32>
    %31 = arith.mulf %30, %29 : vector<8x128xf32>
    %cst_16 = arith.constant dense<0.000000e+00> : vector<8x128xf32>
    %32 = tpu.matmul %22, %3, %cst_16 {dimension_numbers = #tpu.dot_dimension_numbers<[1], [0], [0], [1], [0, 0, 1, 1], [], []>} : vector<8x8xf32>, vector<8x128xf32>, vector<8x128xf32> -> vector<8x128xf32>
    %33 = arith.addf %31, %32 : vector<8x128xf32>
    %c0_17 = arith.constant 0 : index
    %c0_18 = arith.constant 0 : index
    %34 = vector.load %arg9[%c0_17, %c0_18] : memref<8x128xf32, #tpu.memory_space<vmem>>, vector<8x128xf32>
    tpu.vector_store %arg9[%c0_17, %c0_18], %33 {strides = array<i32>} : memref<8x128xf32, #tpu.memory_space<vmem>>, vector<8x128xf32>,
    %c0_19 = arith.constant 0 : index
    %c0_20 = arith.constant 0 : index
    %35 = vector.load %arg7[%c0_19, %c0_20] : memref<8x1xf32, #tpu.memory_space<vmem>>, vector<8x1xf32>
    tpu.vector_store %arg7[%c0_19, %c0_20], %17 {strides = array<i32>} : memref<8x1xf32, #tpu.memory_space<vmem>>, vector<8x1xf32>,
    %c0_i32_21 = arith.constant 0 : i32
    %36 = arith.cmpi eq, %arg1, %c0_i32_21 : i32
    %37 = arith.extui %36 : i1 to i32
    %c0_i32_22 = arith.constant 0 : i32
    %38 = arith.cmpi ne, %37, %c0_i32_22 : i32
    scf.if %38 {
      %c0_23 = arith.constant 0 : index
      %c0_24 = arith.constant 0 : index
      %39 = vector.load %arg2[%c0_23, %c0_24] : memref<8x128xf32, #tpu.memory_space<vmem>>, vector<8x128xf32>
      %c0_25 = arith.constant 0 : index
      %c0_26 = arith.constant 0 : index
      %40 = vector.load %arg9[%c0_25, %c0_26] : memref<8x128xf32, #tpu.memory_space<vmem>>, vector<8x128xf32>
      %c0_27 = arith.constant 0 : index
      %c0_28 = arith.constant 0 : index
      %41 = vector.load %arg8[%c0_27, %c0_28] : memref<8x1xf32, #tpu.memory_space<vmem>>, vector<8x1xf32>
      %42 = tpu.reciprocal %41 : vector<8x1xf32> -> vector<8x1xf32>
      %43 = vector.broadcast %42 : vector<8x1xf32> to vector<8x128xf32>
      %44 = arith.mulf %40, %43 : vector<8x128xf32>
      %45 = arith.subf %39, %44 : vector<8x128xf32>
      %cst_29 = arith.constant 5.000000e-01 : f32
      %46 = vector.broadcast %cst_29 : f32 to vector<8x128xf32>
      %47 = arith.mulf %46, %45 : vector<8x128xf32>
      %48 = arith.addf %39, %47 : vector<8x128xf32>
      %c0_30 = arith.constant 0 : index
      %c0_31 = arith.constant 0 : index
      %49 = vector.load %arg4[%c0_30, %c0_31] : memref<1x128xf32, #tpu.memory_space<vmem>>, vector<1x128xf32>
      %c0_32 = arith.constant 0 : index
      %c0_33 = arith.constant 0 : index
      %50 = vector.load %arg5[%c0_32, %c0_33] : memref<1x128xf32, #tpu.memory_space<vmem>>, vector<1x128xf32>
      %cst_34 = arith.constant dense<0.000000e+00> : vector<8xf32>
      %51 = vector.multi_reduction <add>, %48, %cst_34 [1] : vector<8x128xf32> to vector<8xf32>
      %52 = vector.shape_cast %51 : vector<8xf32> to vector<8x1xf32>
      %cst_35 = arith.constant 3.125000e-02 : f32
      %53 = vector.broadcast %cst_35 : f32 to vector<8x1xf32>
      %54 = arith.mulf %52, %53 : vector<8x1xf32>
      %55 = vector.broadcast %54 : vector<8x1xf32> to vector<8x128xf32>
      %56 = arith.subf %48, %55 : vector<8x128xf32>
      %57 = tpu.iota {dimensions = array<i32: 1>} : vector<1x128xi32>
      %c32_i32 = arith.constant 32 : i32
      %58 = vector.broadcast %c32_i32 : i32 to vector<1x128xi32>
      %59 = arith.cmpi slt, %57, %58 : vector<1x128xi32>
      %60 = arith.extui %59 : vector<1x128xi1> to vector<1x128xi32>
      %61 = arith.sitofp %60 : vector<1x128xi32> to vector<1x128xf32>
      %62 = vector.broadcast %61 : vector<1x128xf32> to vector<8x128xf32>
      %63 = arith.mulf %56, %62 : vector<8x128xf32>
      %64 = arith.mulf %63, %63 : vector<8x128xf32>
      %cst_36 = arith.constant dense<0.000000e+00> : vector<8xf32>
      %65 = vector.multi_reduction <add>, %64, %cst_36 [1] : vector<8x128xf32> to vector<8xf32>
      %66 = vector.shape_cast %65 : vector<8xf32> to vector<8x1xf32>
      %cst_37 = arith.constant 3.125000e-02 : f32
      %67 = vector.broadcast %cst_37 : f32 to vector<8x1xf32>
      %68 = arith.mulf %66, %67 : vector<8x1xf32>
      %cst_38 = arith.constant 9.99999974E-6 : f32
      %69 = vector.broadcast %cst_38 : f32 to vector<8x1xf32>
      %70 = arith.addf %68, %69 : vector<8x1xf32>
      %71 = math.rsqrt %70 : vector<8x1xf32>
      %72 = vector.broadcast %71 : vector<8x1xf32> to vector<8x128xf32>
      %73 = arith.mulf %63, %72 : vector<8x128xf32>
      %74 = vector.broadcast %49 : vector<1x128xf32> to vector<8x128xf32>
      %75 = arith.mulf %73, %74 : vector<8x128xf32>
      %76 = vector.broadcast %50 : vector<1x128xf32> to vector<8x128xf32>
      %77 = arith.addf %75, %76 : vector<8x128xf32>
      %c0_39 = arith.constant 0 : index
      %c0_40 = arith.constant 0 : index
      %78 = vector.load %arg6[%c0_39, %c0_40] : memref<8x128xf32, #tpu.memory_space<vmem>>, vector<8x128xf32>
      tpu.vector_store %arg6[%c0_39, %c0_40], %77 {strides = array<i32>} : memref<8x128xf32, #tpu.memory_space<vmem>>, vector<8x128xf32>,
    } else {
    }
    return
  }
  func.func @transform_0(%arg0: i32, %arg1: i32) -> (i32, i32) {
    %c0_i32 = arith.constant 0 : i32
    %c0_i32_0 = arith.constant 0 : i32
    return %arg0, %c0_i32 : i32, i32
  }
  func.func @transform_1(%arg0: i32, %arg1: i32) -> (i32, i32) {
    %c0_i32 = arith.constant 0 : i32
    %c0_i32_0 = arith.constant 0 : i32
    return %arg1, %c0_i32 : i32, i32
  }
  func.func @transform_2(%arg0: i32, %arg1: i32) -> (i32, i32) {
    %c0_i32 = arith.constant 0 : i32
    %c0_i32_0 = arith.constant 0 : i32
    %c0_i32_1 = arith.constant 0 : i32
    return %c0_i32, %c0_i32_0 : i32, i32
  }
  func.func @transform_3(%arg0: i32, %arg1: i32) -> (i32, i32) {
    %c0_i32 = arith.constant 0 : i32
    %c0_i32_0 = arith.constant 0 : i32
    %c0_i32_1 = arith.constant 0 : i32
    return %c0_i32, %c0_i32_0 : i32, i32
  }
  func.func @transform_4(%arg0: i32, %arg1: i32) -> (i32, i32) {
    %c0_i32 = arith.constant 0 : i32
    %c0_i32_0 = arith.constant 0 : i32
    return %arg0, %c0_i32 : i32, i32
  }
}

</mosaic_0001>

<bundles_post_ra>
// kernel: tpu_custom_call.1
= control target key start
LH: loop header
LB: loop body
LE: loop exit
PB: predicated region body
PF: predicated region fallthrough
CT: control target
= control target key end

     0   :  { %9 = vsyncpa [#allocation7], 0  ;;  %s515_s0 = inlined_call_operand.hbm [shape: f32[8,128], index: 0, kind: input, shape index: {}]   ;;  %s516_s1 = inlined_call_operand.hbm [shape: f32[8,128], index: 1, kind: input, shape index: {}]   ;;  %s517_s2 = inlined_call_operand.vmem [shape: f32[1,128], index: 2, kind: input, shape index: {}]   ;;  %s518_s3 = inlined_call_operand.vmem [shape: f32[1,128], index: 3, kind: input, shape index: {}]   ;;  %s519_s4 = inlined_call_operand.hbm [shape: f32[8,128], index: 4, kind: output, shape index: {}]  }
   0x1   :  { %10 = vsyncpa [#allocation10], 0 }
   0x2   :  { %11 = vsyncpa [#allocation8], 0  ;;  %s421_s15 = smov [#allocation6]   ;;  %s422_s17 = smov [#allocation9]  }
   0x3   :  { %s18_s16 = sshll.u32 %s421_s15, 4  ;;  %s28_s18 = sshll.u32 %s422_s17, 4  ;;  %s19_s16 = int_to_ptr.vmem [resolvable:$true] %s18_s16  ;;  %s29_s18 = int_to_ptr.vmem [resolvable:$true] %s28_s18 }
   0x4   :  { %s349_s21 = scalar_lea.hbm %s515_s0, 128 }
   0x5   :  { %p350_p0 = scmp.ne.s32.totalorder %s515_s0, %s349_s21  ;;  %p353_p1 = scmp.lt.u32.totalorder %s349_s21, %s515_s0 }
   0x7   :  { %p355_p2 = pnand %p353_p1, %p350_p0 }
   0x9   :  { %358 = shalt.err (!%p355_p2)
}
   0xa   :  { %s359_s26 = scalar_lea.vmem %s19_s16, 128  ;;  %p364_p4 = scmp.lt.s32.totalorder %s19_s16, %s19_s16 }
   0xb   :  { %p360_p3 = scmp.ne.s32.totalorder %s19_s16, %s359_s26  ;;  %p365_p5 = scmp.lt.s32.totalorder %s359_s26, %s359_s26 }
   0xd   :  { %p366_p6 = por %p365_p5, %p364_p4 }
   0xf   :  { %p367_p7 = pnand %p366_p6, %p360_p3 }
  0x11   :  { %370 = shalt.err (!%p367_p7)
}
  0x12   :  { %21 = dma.hbm_to_vmem [thread:$0]  %s515_s0, 128, %s19_s16, [#allocation7]  }
  0x13   :  { %s371_s5 = scalar_lea.hbm %s516_s1, 128 }
  0x14   :  { %p372_p8 = scmp.ne.s32.totalorder %s516_s1, %s371_s5  ;;  %p375_p9 = scmp.lt.u32.totalorder %s371_s5, %s516_s1 }
  0x16   :  { %p377_p10 = pnand %p375_p9, %p372_p8 }
  0x18   :  { %380 = shalt.err (!%p377_p10)
}
  0x19   :  { %s381_s10 = scalar_lea.vmem %s29_s18, 128  ;;  %p386_p12 = scmp.lt.s32.totalorder %s29_s18, %s29_s18 }
  0x1a   :  { %p382_p11 = scmp.ne.s32.totalorder %s29_s18, %s381_s10  ;;  %p387_p13 = scmp.lt.s32.totalorder %s381_s10, %s381_s10 }
  0x1c   :  { %p388_p0 = por %p387_p13, %p386_p12 }
  0x1e   :  { %p389_p1 = pnand %p388_p0, %p382_p11 }
  0x20   :  { %392 = shalt.err (!%p389_p1)
}
  0x21   :  { %31 = dma.hbm_to_vmem [thread:$0]  %s516_s1, 128, %s29_s18, [#allocation10]  }
  0x22   :  { %415 = dma.done.wait [#allocation7], 128  }
  0x23   :  { %416 = vsyncadd [#allocation7], 4294967168 }
  0x24   :  { %417 = dma.done.wait [#allocation10], 128  }
  0x25   :  { %418 = vsyncadd [#allocation10], 4294967168  ;;  %v58_v0 = vld [vmem:[#allocation9] sm:$0xff]  ;;  %v477_v1 = vld [vmem:[#allocation6] sm:$0xff]  ;;  %v423_v4 = vmov 0.0   ;;  %vm424_vm0 = vmmov 0   ;;  %v266_v45 = vlaneseq }
  0x26   :  { %v59_v2 = vmul.f32 %v58_v0, %v58_v0  ;;  %v51_v3 = vmul.f32 %v477_v1, %v477_v1  ;;  %318 = vmatprep.subr.mxu0 %v423_v4  ;;  %323 = vmatprep.subr.mxu1 %v423_v4  ;;  %vm46_vm1 = vcmask 7168   ;;  %v425_v13 = vmov -1e+30   ;;  %v312_v57 = vld [vmem:[%s517_s2] ss:$0 sm:$0xff]  ;;  %s427_s15 = smov [#allocation11]  }
  0x27   :  { %324 = vmatpush3.msra.mxu1 %v58_v0  ;;  %320 = vmatprep.mubr.msk.f32.mxu0 %vm424_vm0, %v423_v4  ;;  %47 = vst.msk [vmem:[#allocation2] sm:$0xff] %vm46_vm1, %v425_v13  ;;  %48 = vst.msk [vmem:[#allocation3] sm:$0xff] %vm46_vm1, %v423_v4  ;;  %vm137_vm2 = vcmask 64512   ;;  %v426_v17 = vmov 0   ;;  %v267_v46 = vand.u32 127, %v266_v45  ;;  %s300_s16 = sshll.u32 %s427_s15, 4  ;;  %s301_s16 = int_to_ptr.vmem [resolvable:$true] %s300_s16 }
  0x28   :  { %60 = vadd.xlane.f32.xlu0 %v59_v2  ;;  %325 = vmatprep.mubr.msk.f32.mxu1 %vm424_vm0, %v423_v4  ;;  %v313_v59 = vld [vmem:[%s518_s3] ss:$0 sm:$0xff]  ;;  %s393_s17 = scalar_lea.vmem %s301_s16, 128  ;;  %p398_p3 = scmp.lt.s32.totalorder %s301_s16, %s301_s16 }
  0x29   :  { %335 = vset.pattern.permute.xlu1 %v426_v17  ;;  %336 = vset.pattern.permute.xlu0 %v426_v17  ;;  %vm268_vm3 = vcmp.lt.s32.totalorder %v267_v46, 32  ;;  %p394_p2 = scmp.ne.s32.totalorder %s301_s16, %s393_s17  ;;  %p399_p4 = scmp.lt.s32.totalorder %s393_s17, %s393_s17 }
  0x2a   :  { %v311_v49 = vsel %vm268_vm3, 1.0, %v423_v4 }
  0x2b   :  { %p400_p5 = por %p399_p4, %p398_p3 }
  0x2c   :  { %52 = vadd.xlane.f32.xlu0 %v51_v3 }
  0x2d   :  { %p401_p6 = pnand %p400_p5, %p394_p2 }
  0x2e   :  { %v136_v18 = vld [vmem:[#allocation2] sm:$0xff]  ;;  %v153_v29 = vld [vmem:[#allocation3] sm:$0xff] }
  0xb5   :  { %v61_v5 = vpop.xlane.xlu0 %60 }
  0xb6   :  { %v62_v6 = vmax.f32 %v61_v5, 1e-24 }
  0xb8   :  { %337 = vrsqrt.f32 %v62_v6 }
  0xb9   :  { %v53_v7 = vpop.xlane.xlu0 %52 }
  0xba   :  { %v54_v8 = vmax.f32 %v53_v7, 1e-24 }
  0xbc   :  { %339 = vrsqrt.f32 %v54_v8 }
  0xc2   :  { %v338_v9 = vpop.eup %337 }
  0xc3   :  { %v64_v10 = vmul.f32 %v338_v9, %v58_v0 }
  0xc5   :  { %319 = vmatpush3.xpose.msra.mxu0 %v64_v10 }
  0xc6   :  { %v340_v11 = vpop.eup %339 }
  0xc7   :  { %v56_v12 = vmul.f32 %v340_v11, %v477_v1 }
  0xc9   :  { %321 = vmatmul.mubr.f32.vlgmr.msra.gmra.mrb[0].mxu0 %v56_v12 }
 0x19c   :  { %v132_v14 = vpop.f32.mrb[0].mxu0 }
 0x19d   :  { %v322_v15 = vpop.f32.mrb[1].mxu0  ;;  %v138_v16 = vsel %vm137_vm2, %v132_v14, -inf }
 0x19e   :  { %139 = vmax.xlane.f32.xlu1 %v138_v16 }
 0x22b   :  { %v140_v19 = vpop.xlane.xlu1 %139 }
 0x22c   :  { %v141_v20 = vmax.f32 %v136_v18, %v140_v19 }
 0x22e   :  { %v142_v21 = vsub.f32 %v136_v18, %v141_v20  ;;  %243 = vst.msk [vmem:[#allocation2] sm:$0xff] %vm46_vm1, %v141_v20  ;;  %147 = vperm.xlu1 %335, %v141_v20  }
 0x230   :  { %v143_v27 = vmul.f32 1.442695, %v142_v21 }
 0x2ad   :  { %v148_v22 = vpop.permute.xlu1 %147 }
 0x2ae   :  { %v150_v23 = vsub.f32 %v132_v14, %v148_v22 }
 0x2b0   :  { %v151_v24 = vmul.f32 1.442695, %v150_v23 }
 0x2b2   :  { %341 = vpow2.f32 %v151_v24 }
 0x2b3   :  { %343 = vpow2.f32 %v143_v27 }
 0x2bc   :  { %v342_v25 = vpop.eup %341 }
 0x2bd   :  { %326 = vmatmul.mubr.msk.f32.vlgmr.msra.gmra.mrb[0].mxu1 %vm137_vm2, %v342_v25  ;;  %v155_v26 = vsel %vm137_vm2, %v342_v25, 0.0  ;;  %v344_v28 = vpop.eup %343 }
 0x2be   :  { %156 = vadd.xlane.f32.xlu0 %v155_v26  ;;  %v154_v30 = vmul.f32 %v344_v28, %v153_v29 }
 0x2d4   :  { %164 = vperm.xlu0 %336, %v344_v28  }
 0x34b   :  { %v157_v31 = vpop.xlane.xlu0 %156 }
 0x34c   :  { %v158_v32 = vadd.f32 %v157_v31, %v154_v30 }
 0x34e   :  { %160 = vst.msk [vmem:[#allocation3] sm:$0xff] %vm46_vm1, %v158_v32 }
 0x353   :  { %v165_v37 = vpop.permute.xlu0 %164 }
 0x354   :  { %v167_v38 = vmul.f32 0.0, %v165_v37 }
 0x355   :  { %v249_v33 = vld [vmem:[#allocation3] sm:$0xff] }
 0x356   :  { %345 = vrcp.f32 %v249_v33 }
 0x360   :  { %v346_v34 = vpop.eup %345 }
 0x361   :  { %253 = vperm.xlu1 %335, %v346_v34  }
 0x390   :  { %v237_v35 = vpop.f32.mrb[0].mxu1 }
 0x391   :  { %v327_v36 = vpop.f32.mrb[1].mxu1  ;;  %v241_v39 = vadd.f32 %v237_v35, %v167_v38 }
 0x3e0   :  { %v254_v40 = vpop.permute.xlu1 %253 }
 0x3e1   :  { %v256_v41 = vmul.f32 %v254_v40, %v241_v39 }
 0x3e3   :  { %v257_v42 = vsub.f32 %v477_v1, %v256_v41 }
 0x3e5   :  { %v258_v43 = vmul.f32 0.5, %v257_v42 }
 0x3e7   :  { %v259_v44 = vadd.f32 %v258_v43, %v477_v1 }
 0x3e9   :  { %262 = vadd.xlane.f32.xlu1 %v259_v44 }
 0x476   :  { %v263_v47 = vpop.xlane.xlu1 %262 }
 0x477   :  { %v264_v48 = vmul.f32 0.03125, %v263_v47 }
 0x479   :  { %v265_v50 = vsub.f32 %v259_v44, %v264_v48 }
 0x47b   :  { %v271_v51 = vmul.f32 %v311_v49, %v265_v50 }
 0x47d   :  { %v272_v52 = vmul.f32 %v271_v51, %v271_v51 }
 0x47f   :  { %273 = vadd.xlane.f32.xlu0 %v272_v52 }
 0x50c   :  { %v274_v53 = vpop.xlane.xlu0 %273 }
 0x50d   :  { %v275_v54 = vmul.f32 0.03125, %v274_v53 }
 0x50f   :  { %v276_v55 = vadd.f32 1e-05, %v275_v54 }
 0x511   :  { %347 = vrsqrt.f32 %v276_v55 }
 0x51b   :  { %v348_v56 = vpop.eup %347 }
 0x51c   :  { %v278_v58 = vmul.f32 %v348_v56, %v271_v51 }
 0x51e   :  { %v285_v60 = vmul.f32 %v312_v57, %v278_v58 }
 0x520   :  { %v292_v61 = vadd.f32 %v313_v59, %v285_v60 }
 0x522   :  { %293 = vst [vmem:[#allocation11] sm:$0xff] %v292_v61 }
 0x523   :  { %404 = shalt.err (!%p401_p6)
}
 0x524   :  { %s405_s19 = scalar_lea.hbm %s519_s4, 128 }
 0x525   :  { %p406_p7 = scmp.ne.s32.totalorder %s519_s4, %s405_s19  ;;  %p409_p8 = scmp.lt.u32.totalorder %s405_s19, %s519_s4 }
 0x527   :  { %p411_p9 = pnand %p409_p8, %p406_p7 }
 0x529   :  { %414 = shalt.err (!%p411_p9)
}
 0x52a   :  { %303 = dma.vmem_to_hbm [thread:$0]  %s301_s16, 128, %s519_s4, [#allocation8]  }
 0x52b   :  { %419 = dma.done.wait [#allocation8], 128  }
 0x52c   :  { %420 = vsyncadd [#allocation8], 4294967168 }
 0x52d   :  { %307 = vsyncpa [#allocation7], 1 }
 0x52e   :  { %308 = vsyncpa [#allocation10], 1 }
 0x52f   :  { %309 = vsyncpa [#allocation8], 1 }

</bundles_post_ra>
